<compile_context>
chip_gen: v6e
topology: v6e:2x2x1
jax: 0.10.0
libtpu: 0.0.40
codegen_flags: <defaults>
</compile_context>

<pallas_src>
import jax
import jax.numpy as jnp
from jax.experimental import pallas as pl
from jax.experimental.pallas import tpu as pltpu


def maddpg_critic_kernel(xo_ref, xa_ref, w1o_ref, w1a_ref, b1_ref,
                         w2_ref, b2_ref, w3t_ref, b3_ref, q_ref):
    cdt = w2_ref.dtype  # stream/compute dtype of matmul operands (f32 or bf16)
    # fc1 + ReLU  (concat folded into a split matmul over the two operands);
    # accumulate in f32, bias-add / ReLU in f32.
    h = (jnp.dot(xo_ref[...], w1o_ref[...], preferred_element_type=jnp.float32)
         + jnp.dot(xa_ref[...], w1a_ref[...], preferred_element_type=jnp.float32)
         + b1_ref[...])
    h = jnp.maximum(h, 0.0)
    # fc2 + ReLU (cast activations back to the stream dtype so the MXU pass is
    # bf16-native when bf16 streaming is enabled; accumulation stays f32).
    h = jnp.dot(h.astype(cdt), w2_ref[...],
                preferred_element_type=jnp.float32) + b2_ref[...]
    h = jnp.maximum(h, 0.0)
    # fc3: compute q^T directly by contracting the hidden axis of both
    # operands: (1, hidden) x (tile_b, hidden) -> (1, tile_b).  Keeps the
    # output store lane-dense instead of a (tile_b, 1) masked column.
    qt = jax.lax.dot_general(
        w3t_ref[...], h.astype(cdt),
        dimension_numbers=(((1,), (1,)), ((), ())),
        preferred_element_type=jnp.float32) + b3_ref[...]
    q_ref[0] = qt.astype(q_ref.dtype)


def _round_up(x, m):
    return ((x + m - 1) // m) * m


def _choose_tile_b(batch, requested):
    """Batch tile: multiple of 128, >= 128, <= 8192, and >= 2 grid steps when
    the batch is big enough (so the parallel batch axis can use both v7x TCs)."""
    requested = max(128, min(int(requested), 8192))
    tile = (requested // 128) * 128
    # Never exceed the 128-aligned batch: a huge mostly-empty block is waste.
    tile = min(tile, _round_up(batch, 128))
    # Prefer >= 2 grid steps when the batch allows it (v7x megacore sharding).
    if batch > 128 and pl.cdiv(batch, tile) < 2:
        tile = max(128, _round_up(pl.cdiv(batch, 2), 128))
    return tile


def _vmem_limit_bytes(tile_b, stream_dtype):
    """Scoped-VMEM budget for this tile: (tile_b, feat) input blocks are
    lane-padded to 128 lanes in VMEM, double-buffered; intermediates are f32."""
    lane = 128
    itemsize = jnp.dtype(stream_dtype).itemsize
    streams = 2 * 2 * tile_b * lane * itemsize   # xo + xa blocks, 2 buffers each
    out = 2 * 8 * tile_b * 4                     # (1,1,tile_b) f32 q blocks, padded
    weights = 2 * 6 * lane * lane * 4            # all weight/bias blocks (generous)
    scratch = 6 * tile_b * lane * 4              # in-kernel f32 intermediates
    budget = streams + out + weights + scratch + (2 << 20)
    # Never below the v6e/v7x default (32 MiB), never above v7x physical (64 MiB).
    return int(min(max(budget, 32 << 20), 64 << 20))


def maddpg_critic_forward(inputs, actions, params, *, tile_b=4096,
                          stream_dtype=jnp.bfloat16):
    """inputs: (..., d_obs), actions: (..., d_act) -> q: (..., 1).

    stream_dtype: dtype used for the matmul operands streamed into the kernel
    (weights + activations).  Accumulation is always f32.  Use jnp.float32 for
    exact parity with the PyTorch f32 reference.
    """
    w1, b1, w2, b2, w3, b3 = params

    lead = inputs.shape[:-1]
    d_obs = inputs.shape[-1]
    d_act = actions.shape[-1]
    hidden = w1.shape[1]

    # Flatten leading dims only (no concat, no pad -> no extra HBM traffic).
    xo = inputs.reshape(-1, d_obs).astype(stream_dtype)
    xa = actions.reshape(-1, d_act).astype(stream_dtype)
    batch = xo.shape[0]

    # Split W1 rows to fold the concat into two matmuls.
    # Concat order is [inputs, actions], so W1[:d_obs] pairs with inputs.
    w1o = w1[:d_obs].astype(stream_dtype)
    w1a = w1[d_obs:].astype(stream_dtype)
    w2s = w2.astype(stream_dtype)
    w3t = w3.T.astype(stream_dtype)                        # (1, hidden)
    b1f = jnp.asarray(b1, jnp.float32).reshape(1, hidden)
    b2f = jnp.asarray(b2, jnp.float32).reshape(1, hidden)
    b3f = jnp.asarray(b3, jnp.float32).reshape(1, 1)

    tile_b = _choose_tile_b(batch, tile_b)
    n_tiles = pl.cdiv(batch, tile_b)
    grid = (n_tiles,)

    q_tiles = pl.pallas_call(
        maddpg_critic_kernel,
        out_shape=jax.ShapeDtypeStruct((n_tiles, 1, tile_b), jnp.float32),
        grid_spec=pltpu.PrefetchScalarGridSpec(
            num_scalar_prefetch=0,
            grid=grid,
            in_specs=[
                pl.BlockSpec((tile_b, d_obs), lambda i: (i, 0)),    # obs tile
                pl.BlockSpec((tile_b, d_act), lambda i: (i, 0)),    # act tile
                pl.BlockSpec((d_obs, hidden), lambda i: (0, 0)),    # W1[:d_obs]
                pl.BlockSpec((d_act, hidden), lambda i: (0, 0)),    # W1[d_obs:]
                pl.BlockSpec((1, hidden), lambda i: (0, 0)),        # b1 (f32)
                pl.BlockSpec((hidden, hidden), lambda i: (0, 0)),   # W2
                pl.BlockSpec((1, hidden), lambda i: (0, 0)),        # b2 (f32)
                pl.BlockSpec((1, hidden), lambda i: (0, 0)),        # W3^T
                pl.BlockSpec((1, 1), lambda i: (0, 0)),             # b3 (f32)
            ],
            out_specs=pl.BlockSpec((1, 1, tile_b), lambda i: (i, 0, 0)),
        ),
        compiler_params=pltpu.CompilerParams(
            dimension_semantics=("parallel",),
            vmem_limit_bytes=_vmem_limit_bytes(tile_b, stream_dtype)),
    )(xo, xa, w1o, w1a, b1f, w2s, b2f, w3t, b3f)

    # (n_tiles, 1, tile_b) -> row-major flat batch; drop tail padding rows.
    q = q_tiles.reshape(-1)[:batch].reshape(*lead, 1)
    return q


def init_linear(key, fan_in, fan_out):
    # PyTorch nn.Linear default init: U(-1/sqrt(fan_in), 1/sqrt(fan_in))
    kw, kb = jax.random.split(key)
    bound = 1.0 / jnp.sqrt(jnp.asarray(fan_in, jnp.float32))
    w = jax.random.uniform(kw, (fan_in, fan_out), jnp.float32, -bound, bound)
    b = jax.random.uniform(kb, (1, fan_out), jnp.float32, -bound, bound)
    return w, b


def reference_forward(inputs, actions, params):
    w1, b1, w2, b2, w3, b3 = params
    x = jnp.concatenate([inputs, actions], axis=-1)
    x = jax.nn.relu(x @ w1 + b1)
    x = jax.nn.relu(x @ w2 + b2)
    return x @ w3 + b3


if __name__ == "__main__":
    # Synthetic MADDPG config:
    #   n_agents=4, n_actions=6, state vshape=16,
    #   obs_individual_obs=False, obs_agent_id=False, obs_last_action=True
    # => input_shape = 16 (state) + 4 (n_agents) + 6 (n_actions) = 26
    #    inputs feature dim = 20, actions dim = 6.
    n_agents = 4
    n_actions = 6
    state_dim = 16
    d_obs = state_dim + n_agents          # 20
    d_act = n_actions                     # 6
    d_in = d_obs + d_act                  # fc1 in_features = 26
    hidden_dim = 32
    batch = 2

    key = jax.random.PRNGKey(0)
    k_in, k_act, k1, k2, k3, k_big = jax.random.split(key, 6)

    inputs = jax.random.normal(k_in, (batch, n_agents, d_obs), jnp.float32)
    actions = jax.random.normal(k_act, (batch, n_agents, d_act), jnp.float32)

    w1, b1 = init_linear(k1, d_in, hidden_dim)
    w2, b2 = init_linear(k2, hidden_dim, hidden_dim)
    w3, b3 = init_linear(k3, hidden_dim, 1)
    params = (w1, b1, w2, b2, w3, b3)

    q_ref = reference_forward(inputs, actions, params)

    # 1) Exact-f32 path: must match the PyTorch/JAX f32 reference tightly.
    q_f32 = maddpg_critic_forward(inputs, actions, params,
                                  stream_dtype=jnp.float32)
    q_f32 = jax.block_until_ready(q_f32)
    assert q_f32.shape == (batch, n_agents, 1), q_f32.shape
    assert jnp.allclose(q_f32, q_ref, atol=1e-5, rtol=1e-5), (
        f"f32 max err {jnp.max(jnp.abs(q_f32 - q_ref))}")

    # 2) Default bf16-streaming (perf) path: f32 accumulation, loose tolerance.
    q_bf16 = maddpg_critic_forward(inputs, actions, params)
    q_bf16 = jax.block_until_ready(q_bf16)
    assert q_bf16.shape == (batch, n_agents, 1), q_bf16.shape
    assert jnp.allclose(q_bf16, q_ref, atol=5e-2, rtol=5e-2), (
        f"bf16 max err {jnp.max(jnp.abs(q_bf16 - q_ref))}")

    # 3) Multi-tile path (>=2 grid steps + overhanging tail block), still small.
    big_b = 60                                 # flat batch = 240 -> 2 tiles of 128
    inputs_b = jax.random.normal(k_big, (big_b, n_agents, d_obs), jnp.float32)
    actions_b = jax.random.normal(k_act, (big_b, n_agents, d_act), jnp.float32)
    q_big = maddpg_critic_forward(inputs_b, actions_b, params,
                                  stream_dtype=jnp.float32)
    q_big = jax.block_until_ready(q_big)
    q_big_ref = reference_forward(inputs_b, actions_b, params)
    assert q_big.shape == (big_b, n_agents, 1), q_big.shape
    assert jnp.allclose(q_big, q_big_ref, atol=1e-5, rtol=1e-5), (
        f"multi-tile max err {jnp.max(jnp.abs(q_big - q_big_ref))}")

    print("KERNEL_OK")
</pallas_src>

<mosaic_0001>
module attributes {stable_mosaic.version = 11 : i64} {
  func.func @maddpg_critic_kernel(%arg0: i32, %arg1: memref<128x20xf32, #tpu.memory_space<vmem>>, %arg2: memref<128x6xf32, #tpu.memory_space<vmem>>, %arg3: memref<20x32xf32, #tpu.memory_space<vmem>>, %arg4: memref<6x32xf32, #tpu.memory_space<vmem>>, %arg5: memref<1x32xf32, #tpu.memory_space<vmem>>, %arg6: memref<32x32xf32, #tpu.memory_space<vmem>>, %arg7: memref<1x32xf32, #tpu.memory_space<vmem>>, %arg8: memref<1x32xf32, #tpu.memory_space<vmem>>, %arg9: memref<1x1xf32, #tpu.memory_space<vmem>>, %arg10: memref<1x1x128xf32, #tpu.memory_space<vmem>>) attributes {dimension_semantics = [#tpu.dimension_semantics<parallel>], iteration_bounds = array<i64: 1>, scalar_prefetch = 0 : i64, scratch_operands = 0 : i64, tpu.core_type = #tpu.core_type<tc>, window_params = [{transform_indices = @transform_0, window_bounds = array<i64: 128, 20>}, {transform_indices = @transform_1, window_bounds = array<i64: 128, 6>}, {pipeline_mode = #tpu.pipeline_mode<synchronous>, transform_indices = @transform_2, window_bounds = array<i64: 20, 32>}, {pipeline_mode = #tpu.pipeline_mode<synchronous>, transform_indices = @transform_3, window_bounds = array<i64: 6, 32>}, {pipeline_mode = #tpu.pipeline_mode<synchronous>, transform_indices = @transform_4, window_bounds = array<i64: 1, 32>}, {pipeline_mode = #tpu.pipeline_mode<synchronous>, transform_indices = @transform_5, window_bounds = array<i64: 32, 32>}, {pipeline_mode = #tpu.pipeline_mode<synchronous>, transform_indices = @transform_6, window_bounds = array<i64: 1, 32>}, {pipeline_mode = #tpu.pipeline_mode<synchronous>, transform_indices = @transform_7, window_bounds = array<i64: 1, 32>}, {pipeline_mode = #tpu.pipeline_mode<synchronous>, transform_indices = @transform_8, window_bounds = array<i64: 1, 1>}, {transform_indices = @transform_9, window_bounds = array<i64: 1, 1, 128>}]} {
    %c0 = arith.constant 0 : index
    %c0_0 = arith.constant 0 : index
    %0 = vector.load %arg1[%c0, %c0_0] : memref<128x20xf32, #tpu.memory_space<vmem>>, vector<128x20xf32>
    %c0_1 = arith.constant 0 : index
    %c0_2 = arith.constant 0 : index
    %1 = vector.load %arg3[%c0_1, %c0_2] : memref<20x32xf32, #tpu.memory_space<vmem>>, vector<20x32xf32>
    %cst = arith.constant dense<0.000000e+00> : vector<128x32xf32>
    %2 = tpu.matmul %0, %1, %cst {dimension_numbers = #tpu.dot_dimension_numbers<[1], [0], [0], [1], [0, 0, 1, 1], [], []>} : vector<128x20xf32>, vector<20x32xf32>, vector<128x32xf32> -> vector<128x32xf32>
    %c0_3 = arith.constant 0 : index
    %c0_4 = arith.constant 0 : index
    %3 = vector.load %arg2[%c0_3, %c0_4] : memref<128x6xf32, #tpu.memory_space<vmem>>, vector<128x6xf32>
    %c0_5 = arith.constant 0 : index
    %c0_6 = arith.constant 0 : index
    %4 = vector.load %arg4[%c0_5, %c0_6] : memref<6x32xf32, #tpu.memory_space<vmem>>, vector<6x32xf32>
    %cst_7 = arith.constant dense<0.000000e+00> : vector<128x32xf32>
    %5 = tpu.matmul %3, %4, %cst_7 {dimension_numbers = #tpu.dot_dimension_numbers<[1], [0], [0], [1], [0, 0, 1, 1], [], []>} : vector<128x6xf32>, vector<6x32xf32>, vector<128x32xf32> -> vector<128x32xf32>
    %6 = arith.addf %2, %5 : vector<128x32xf32>
    %c0_8 = arith.constant 0 : index
    %c0_9 = arith.constant 0 : index
    %7 = vector.load %arg5[%c0_8, %c0_9] : memref<1x32xf32, #tpu.memory_space<vmem>>, vector<1x32xf32>
    %8 = vector.broadcast %7 : vector<1x32xf32> to vector<128x32xf32>
    %9 = arith.addf %6, %8 : vector<128x32xf32>
    %cst_10 = arith.constant 0.000000e+00 : f32
    %10 = vector.broadcast %cst_10 : f32 to vector<128x32xf32>
    %11 = arith.maximumf %9, %10 : vector<128x32xf32>
    %c0_11 = arith.constant 0 : index
    %c0_12 = arith.constant 0 : index
    %12 = vector.load %arg6[%c0_11, %c0_12] : memref<32x32xf32, #tpu.memory_space<vmem>>, vector<32x32xf32>
    %cst_13 = arith.constant dense<0.000000e+00> : vector<128x32xf32>
    %13 = tpu.matmul %11, %12, %cst_13 {dimension_numbers = #tpu.dot_dimension_numbers<[1], [0], [0], [1], [0, 0, 1, 1], [], []>} : vector<128x32xf32>, vector<32x32xf32>, vector<128x32xf32> -> vector<128x32xf32>
    %c0_14 = arith.constant 0 : index
    %c0_15 = arith.constant 0 : index
    %14 = vector.load %arg7[%c0_14, %c0_15] : memref<1x32xf32, #tpu.memory_space<vmem>>, vector<1x32xf32>
    %15 = vector.broadcast %14 : vector<1x32xf32> to vector<128x32xf32>
    %16 = arith.addf %13, %15 : vector<128x32xf32>
    %cst_16 = arith.constant 0.000000e+00 : f32
    %17 = vector.broadcast %cst_16 : f32 to vector<128x32xf32>
    %18 = arith.maximumf %16, %17 : vector<128x32xf32>
    %c0_17 = arith.constant 0 : index
    %c0_18 = arith.constant 0 : index
    %19 = vector.load %arg8[%c0_17, %c0_18] : memref<1x32xf32, #tpu.memory_space<vmem>>, vector<1x32xf32>
    %cst_19 = arith.constant dense<0.000000e+00> : vector<1x128xf32>
    %20 = tpu.matmul %19, %18, %cst_19 {dimension_numbers = #tpu.dot_dimension_numbers<[1], [1], [0], [0], [0, 0, 1, 0], [], []>} : vector<1x32xf32>, vector<128x32xf32>, vector<1x128xf32> -> vector<1x128xf32>
    %c0_20 = arith.constant 0 : index
    %c0_21 = arith.constant 0 : index
    %21 = vector.load %arg9[%c0_20, %c0_21] : memref<1x1xf32, #tpu.memory_space<vmem>>, vector<1x1xf32>
    %22 = vector.broadcast %21 : vector<1x1xf32> to vector<1x128xf32>
    %23 = arith.addf %20, %22 : vector<1x128xf32>
    %c0_22 = arith.constant 0 : index
    %c0_23 = arith.constant 0 : index
    %c0_24 = arith.constant 0 : index
    %24 = vector.load %arg10[%c0_22, %c0_23, %c0_24] : memref<1x1x128xf32, #tpu.memory_space<vmem>>, vector<1x1x128xf32>
    %25 = vector.shape_cast %24 : vector<1x1x128xf32> to vector<1x128xf32>
    %26 = vector.shape_cast %23 : vector<1x128xf32> to vector<1x1x128xf32>
    tpu.vector_store %arg10[%c0_22, %c0_23, %c0_24], %26 {strides = array<i32>} : memref<1x1x128xf32, #tpu.memory_space<vmem>>, vector<1x1x128xf32>,
    return
  }
  func.func @transform_0(%arg0: i32) -> (i32, i32) {
    %c0_i32 = arith.constant 0 : i32
    %c0_i32_0 = arith.constant 0 : i32
    return %arg0, %c0_i32 : i32, i32
  }
  func.func @transform_1(%arg0: i32) -> (i32, i32) {
    %c0_i32 = arith.constant 0 : i32
    %c0_i32_0 = arith.constant 0 : i32
    return %arg0, %c0_i32 : i32, i32
  }
  func.func @transform_2(%arg0: i32) -> (i32, i32) {
    %c0_i32 = arith.constant 0 : i32
    %c0_i32_0 = arith.constant 0 : i32
    %c0_i32_1 = arith.constant 0 : i32
    return %c0_i32, %c0_i32_0 : i32, i32
  }
  func.func @transform_3(%arg0: i32) -> (i32, i32) {
    %c0_i32 = arith.constant 0 : i32
    %c0_i32_0 = arith.constant 0 : i32
    %c0_i32_1 = arith.constant 0 : i32
    return %c0_i32, %c0_i32_0 : i32, i32
  }
  func.func @transform_4(%arg0: i32) -> (i32, i32) {
    %c0_i32 = arith.constant 0 : i32
    %c0_i32_0 = arith.constant 0 : i32
    %c0_i32_1 = arith.constant 0 : i32
    return %c0_i32, %c0_i32_0 : i32, i32
  }
  func.func @transform_5(%arg0: i32) -> (i32, i32) {
    %c0_i32 = arith.constant 0 : i32
    %c0_i32_0 = arith.constant 0 : i32
    %c0_i32_1 = arith.constant 0 : i32
    return %c0_i32, %c0_i32_0 : i32, i32
  }
  func.func @transform_6(%arg0: i32) -> (i32, i32) {
    %c0_i32 = arith.constant 0 : i32
    %c0_i32_0 = arith.constant 0 : i32
    %c0_i32_1 = arith.constant 0 : i32
    return %c0_i32, %c0_i32_0 : i32, i32
  }
  func.func @transform_7(%arg0: i32) -> (i32, i32) {
    %c0_i32 = arith.constant 0 : i32
    %c0_i32_0 = arith.constant 0 : i32
    %c0_i32_1 = arith.constant 0 : i32
    return %c0_i32, %c0_i32_0 : i32, i32
  }
  func.func @transform_8(%arg0: i32) -> (i32, i32) {
    %c0_i32 = arith.constant 0 : i32
    %c0_i32_0 = arith.constant 0 : i32
    %c0_i32_1 = arith.constant 0 : i32
    return %c0_i32, %c0_i32_0 : i32, i32
  }
  func.func @transform_9(%arg0: i32) -> (i32, i32, i32) {
    %c0_i32 = arith.constant 0 : i32
    %c0_i32_0 = arith.constant 0 : i32
    %c0_i32_1 = arith.constant 0 : i32
    return %arg0, %c0_i32, %c0_i32_0 : i32, i32, i32
  }
}

</mosaic_0001>

<bundles_post_ra>
// kernel: tpu_custom_call.1
= control target key start
LH: loop header
LB: loop body
LE: loop exit
PB: predicated region body
PF: predicated region fallthrough
CT: control target
= control target key end

     0   :  { %s1560_s0 = inlined_call_operand.hbm [shape: f32[8,20], index: 0, kind: input, shape index: {}]   ;;  %s1561_s1 = inlined_call_operand.hbm [shape: f32[8,6], index: 1, kind: input, shape index: {}]   ;;  %s1562_s2 = inlined_call_operand.hbm [shape: f32[20,32], index: 2, kind: input, shape index: {}]   ;;  %s1563_s3 = inlined_call_operand.hbm [shape: f32[6,32], index: 3, kind: input, shape index: {}]   ;;  %s1564_s4 = inlined_call_operand.vmem [shape: f32[1,32], index: 4, kind: input, shape index: {}]   ;;  %s1565_s5 = inlined_call_operand.hbm [shape: f32[32,32], index: 5, kind: input, shape index: {}]   ;;  %s1566_s6 = inlined_call_operand.vmem [shape: f32[1,32], index: 6, kind: input, shape index: {}]   ;;  %s1567_s7 = inlined_call_operand.vmem [shape: f32[1,32], index: 7, kind: input, shape index: {}]   ;;  %s1568_s8 = inlined_call_operand.<no memory space> [shape: f32[1,1], index: 8, kind: input, shape index: {}]   ;;  %s1569_s9 = inlined_call_operand.hbm [shape: f32[1,1,128], index: 9, kind: output, shape index: {}]  }
   0x1   :  { %v14_v0 = vstv %s1568_s8 }
   0x2   :  { %15 = vst [vmem:[#allocation2] sm:$0x1] %v14_v0 }
   0x3   :  { %16 = vsyncpa [#allocation4], 0 }
   0x4   :  { %17 = vsyncpa [#allocation7], 0 }
   0x5   :  { %18 = vsyncpa [#allocation10], 0 }
   0x6   :  { %19 = vsyncpa [#allocation5], 0 }
   0x7   :  { %24 = vsyncadd [#allocation4], 1920  ;;  %s1348_s11 = smov [#allocation3]  }
   0x8   :  { %s25_s12 = sshll.u32 %s1348_s11, 4  ;;  %s26_s12 = int_to_ptr.vmem [resolvable:$true] %s25_s12 }
   0x9   :  { %s1228_s13 = scalar_lea.vmem %s26_s12, 128  ;;  %s1232_s14 = scalar_lea.vmem %s26_s12, 2048 }
   0xa   :  { %p1229_p0 = scmp.ne.s32.totalorder %s26_s12, %s1228_s13  ;;  %p1233_p1 = scmp.lt.s32.totalorder %s26_s12, %s26_s12 }
   0xb   :  { %p1234_p2 = scmp.lt.s32.totalorder %s1232_s14, %s1228_s13 }
   0xd   :  { %p1235_p3 = por %p1234_p2, %p1233_p1 }
   0xf   :  { %p1236_p4 = pnand %p1235_p3, %p1229_p0 }
  0x11   :  { %1239 = shalt.err (!%p1236_p4)
}
  0x12   :  { %s1349_s15 = smov 128   ;;  %s1350_s16 = smov 8  }
  0x13   :  { %31 = dma.hbm_to_vmem [thread:$0]  %s1560_s0, 128, %s26_s12, [#allocation4], %s1349_s15, %s1349_s15, %s1350_s16  }
  0x14   :  { %36 = vsyncadd [#allocation7], 1920  ;;  %s1351_s18 = smov [#allocation6]   ;;  %s1352_s20 = smov [#allocation9]  }
  0x15   :  { %s37_s19 = sshll.u32 %s1351_s18, 4  ;;  %s62_s21 = sshll.u32 %s1352_s20, 4  ;;  %s38_s19 = int_to_ptr.vmem [resolvable:$true] %s37_s19  ;;  %s63_s21 = int_to_ptr.vmem [resolvable:$true] %s62_s21 }
  0x16   :  { %s1248_s22 = scalar_lea.vmem %s38_s19, 128  ;;  %s1252_s23 = scalar_lea.vmem %s38_s19, 2048 }
  0x17   :  { %p1249_p5 = scmp.ne.s32.totalorder %s38_s19, %s1248_s22  ;;  %p1253_p6 = scmp.lt.s32.totalorder %s38_s19, %s38_s19 }
  0x18   :  { %p1254_p7 = scmp.lt.s32.totalorder %s1252_s23, %s1248_s22 }
  0x1a   :  { %p1255_p8 = por %p1254_p7, %p1253_p6 }
  0x1c   :  { %p1256_p9 = pnand %p1255_p8, %p1249_p5 }
  0x1e   :  { %1259 = shalt.err (!%p1256_p9)
}
  0x1f   :  { %43 = dma.hbm_to_vmem [thread:$0]  %s1561_s1, 128, %s38_s19, [#allocation7], %s1349_s15, %s1349_s15, %s1350_s16  }
  0x20   :  { %s1268_s25 = scalar_lea.vmem %s63_s21, 128  ;;  %p1273_p11 = scmp.lt.s32.totalorder %s63_s21, %s63_s21 }
  0x21   :  { %p1269_p10 = scmp.ne.s32.totalorder %s63_s21, %s1268_s25  ;;  %p1274_p12 = scmp.lt.s32.totalorder %s1268_s25, %s1268_s25 }
  0x23   :  { %p1275_p13 = por %p1274_p12, %p1273_p11 }
  0x25   :  { %p1276_p0 = pnand %p1275_p13, %p1269_p10 }
  0x27   :  { %1279 = shalt.err (!%p1276_p0)
}
  0x28   :  { %65 = dma.hbm_to_vmem [thread:$0]  %s1563_s3, 128, %s63_s21, [#allocation10]  }
  0x29   :  { %s1353_s28 = smov [#allocation8]   ;;  %s1354_s30 = smov [#allocation11]  }
  0x2a   :  { %s49_s29 = sshll.u32 %s1353_s28, 4  ;;  %s73_s10 = sshll.u32 %s1354_s30, 4  ;;  %s50_s29 = int_to_ptr.vmem [resolvable:$true] %s49_s29  ;;  %s74_s10 = int_to_ptr.vmem [resolvable:$true] %s73_s10 }
  0x2b   :  { %s1288_s11 = scalar_lea.vmem %s50_s29, 384  ;;  %p1293_p2 = scmp.lt.s32.totalorder %s50_s29, %s50_s29 }
  0x2c   :  { %p1289_p1 = scmp.ne.s32.totalorder %s50_s29, %s1288_s11  ;;  %p1294_p3 = scmp.lt.s32.totalorder %s1288_s11, %s1288_s11 }
  0x2e   :  { %p1295_p4 = por %p1294_p3, %p1293_p2 }
  0x30   :  { %p1296_p5 = pnand %p1295_p4, %p1289_p1 }
  0x32   :  { %1299 = shalt.err (!%p1296_p5)
}
  0x33   :  { %55 = dma.hbm_to_vmem [thread:$0]  %s1562_s2, 384, %s50_s29, [#allocation7], %s1349_s15, %s1349_s15, %s1350_s16  }
  0x34   :  { %s1308_s3 = scalar_lea.vmem %s74_s10, 512  ;;  %p1313_p7 = scmp.lt.s32.totalorder %s74_s10, %s74_s10 }
  0x35   :  { %p1309_p6 = scmp.ne.s32.totalorder %s74_s10, %s1308_s3  ;;  %p1314_p8 = scmp.lt.s32.totalorder %s1308_s3, %s1308_s3 }
  0x37   :  { %p1315_p9 = por %p1314_p8, %p1313_p7 }
  0x39   :  { %p1316_p10 = pnand %p1315_p9, %p1309_p6 }
  0x3b   :  { %1319 = shalt.err (!%p1316_p10)
}
  0x3c   :  { %79 = dma.hbm_to_vmem [thread:$0]  %s1565_s5, 512, %s74_s10, [#allocation10], %s1349_s15, %s1349_s15, %s1350_s16  }
  0x3d   :  { %1340 = dma.done.wait [#allocation4], 2048  }
  0x3e   :  { %1341 = vsyncadd [#allocation4], 4294965248 }
  0x3f   :  { %1342 = dma.done.wait [#allocation7], 2432  }
  0x40   :  { %1343 = vsyncadd [#allocation7], 4294964864 }
  0x41   :  { %1344 = dma.done.wait [#allocation10], 640  }
  0x42   :  { %1345 = vsyncadd [#allocation10], 4294966656  ;;  %vm384_vm0 = vcmask 1043456   ;;  %vm186_vm1 = vcmask 1045504   ;;  %v119_v1 = vld [vmem:[#allocation8 + $0x10] sm:$0xf] }
  0x43   :  { %v136_v2 = vld [vmem:[#allocation9] sm:$0x3f]  ;;  %v118_v3 = vld [vmem:[#allocation8 + $0x8] sm:$0xff]  ;;  %vm137_vm2 = vcmask 48128   ;;  %1111 = vmatprep.subr.msk.mxu1 %vm384_vm0, %v119_v1  ;;  %v120_v4 = vld [vmem:[#allocation6] sm:$0xff]  ;;  %vm335_vm3 = vcmask 162816  }
  0x44   :  { %1085 = vmatprep.subr.msk.mxu0 %vm186_vm1, %v136_v2  ;;  %v121_v5 = vld [vmem:[#allocation6 + $0x8] sm:$0xff]  ;;  %1112 = vmatpush3.msk.msra.mxu1 %vm384_vm0, %v119_v1  ;;  %v117_v6 = vld [vmem:[#allocation8] sm:$0xff]  ;;  %v122_v8 = vld [vmem:[#allocation6 + $0x10] sm:$0xff]  ;;  %vm583_vm4 = vcmask 261120   ;;  %vm1356_vm5 = vmmov 0   ;;  %s1358_s8 = smov [#allocation12]  }
  0x45   :  { %1086 = vmatpush3.msk.msra.mxu0 %vm186_vm1, %v136_v2  ;;  %v101_v7 = vld [vmem:[#allocation3] sm:$0xff]  ;;  %1113 = vmatprep.subr.mxu1 %v118_v3  ;;  %v102_v9 = vld [vmem:[#allocation3 + $0x8] sm:$0xff]  ;;  %v123_v10 = vld [vmem:[#allocation6 + $0x18] sm:$0xff]  ;;  %s932_s17 = sshll.u32 %s1358_s8, 4  ;;  %s933_s17 = int_to_ptr.vmem [resolvable:$true] %s932_s17 }
  0x46   :  { %1087 = vmatprep.mubr.msk.f32.mxu0 %vm137_vm2, %v120_v4  ;;  %1114 = vmatpush3.msra.mxu1 %v118_v3  ;;  %v103_v11 = vld [vmem:[#allocation3 + $0x10] sm:$0xff]  ;;  %v124_v12 = vld [vmem:[#allocation6 + $0x20] sm:$0xff]  ;;  %v104_v13 = vld [vmem:[#allocation3 + $0x18] sm:$0xff]  ;;  %s1320_s18 = scalar_lea.vmem %s933_s17, 16  ;;  %s1324_s19 = scalar_lea.vmem %s933_s17, 32 }
  0x47   :  { %1088 = vmatmul.mubr.msk.f32.vlgmr.msra.gmra.mxu0 %vm137_vm2, %v121_v5  ;;  %1115 = vmatprep.subr.mxu1 %v117_v6  ;;  %v125_v14 = vld [vmem:[#allocation6 + $0x28] sm:$0xff]  ;;  %v105_v15 = vld [vmem:[#allocation3 + $0x20] sm:$0xff]  ;;  %v126_v16 = vld [vmem:[#allocation6 + $0x30] sm:$0xff]  ;;  %p1321_p11 = scmp.ne.s32.totalorder %s933_s17, %s1320_s18  ;;  %p1325_p12 = scmp.lt.s32.totalorder %s933_s17, %s933_s17 }
  0x48   :  { %1117 = vmatprep.mubr.msk.f32.mxu1 %vm335_vm3, %v101_v7  ;;  %1116 = vmatpush3.msra.mxu1 %v117_v6  ;;  %v106_v17 = vld [vmem:[#allocation3 + $0x28] sm:$0xff]  ;;  %v575_v18 = vld [vmem:[#allocation11 + $0x18] sm:$0xff]  ;;  %v574_v19 = vld [vmem:[#allocation11 + $0x10] sm:$0xff]  ;;  %p1326_p13 = scmp.lt.s32.totalorder %s1324_s19, %s1320_s18 }
  0x49   :  { %1090 = vmatprep.mubr.msk.f32.mxu0 %vm137_vm2, %v122_v8  ;;  %1118 = vmatmul.mubr.msk.f32.vlgmr.msra.gmra.mxu1 %vm335_vm3, %v102_v9  ;;  %v127_v20 = vld [vmem:[#allocation6 + $0x38] sm:$0xff]  ;;  %v107_v21 = vld [vmem:[#allocation3 + $0x30] sm:$0xff]  ;;  %v128_v22 = vld [vmem:[#allocation6 + $0x40] sm:$0xff] }
  0x4a   :  { %1120 = vmatprep.mubr.msk.f32.mxu1 %vm335_vm3, %v103_v11  ;;  %1141 = vmatprep.subr.mxu0 %v575_v18  ;;  %v573_v23 = vld [vmem:[#allocation11 + $0x8] sm:$0xff]  ;;  %v108_v24 = vld [vmem:[#allocation3 + $0x38] sm:$0xff]  ;;  %v109_v26 = vld [vmem:[#allocation3 + $0x40] sm:$0xff]  ;;  %p1327_p0 = por %p1326_p13, %p1325_p12 }
  0x4b   :  { %1091 = vmatmul.mubr.msk.f32.gmra.mxu0 %vm137_vm2, %v123_v10  ;;  %v129_v25 = vld [vmem:[#allocation6 + $0x48] sm:$0xff]  ;;  %v130_v27 = vld [vmem:[#allocation6 + $0x50] sm:$0xff]  ;;  %v131_v29 = vld [vmem:[#allocation6 + $0x58] sm:$0xff] }
  0x4c   :  { %1093 = vmatprep.mubr.msk.f32.mxu0 %vm137_vm2, %v124_v12  ;;  %1142 = vmatpush3.msra.mxu0 %v575_v18  ;;  %v110_v28 = vld [vmem:[#allocation3 + $0x48] sm:$0xff]  ;;  %v111_v30 = vld [vmem:[#allocation3 + $0x50] sm:$0xff]  ;;  %v132_v31 = vld [vmem:[#allocation6 + $0x60] sm:$0xff]  ;;  %p1328_p1 = pnand %p1327_p0, %p1321_p11 }
  0x4d   :  { %1121 = vmatmul.mubr.msk.f32.gmra.mxu1 %vm335_vm3, %v104_v13  ;;  %1143 = vmatprep.subr.mxu0 %v574_v19  ;;  %v112_v32 = vld [vmem:[#allocation3 + $0x58] sm:$0xff]  ;;  %v133_v33 = vld [vmem:[#allocation6 + $0x68] sm:$0xff]  ;;  %v113_v34 = vld [vmem:[#allocation3 + $0x60] sm:$0xff] }
  0x4e   :  { %1123 = vmatprep.mubr.msk.f32.mxu1 %vm335_vm3, %v105_v15  ;;  %1144 = vmatpush3.msra.mxu0 %v574_v19  ;;  %v134_v35 = vld [vmem:[#allocation6 + $0x70] sm:$0xff]  ;;  %v114_v36 = vld [vmem:[#allocation3 + $0x68] sm:$0xff]  ;;  %v135_v37 = vld [vmem:[#allocation6 + $0x78] sm:$0xff] }
  0x4f   :  { %1094 = vmatmul.mubr.msk.f32.gmra.mxu0 %vm137_vm2, %v125_v14  ;;  %1145 = vmatprep.subr.mxu0 %v573_v23  ;;  %v115_v38 = vld [vmem:[#allocation3 + $0x70] sm:$0xff]  ;;  %v116_v39 = vld [vmem:[#allocation3 + $0x78] sm:$0xff]  ;;  %v572_v40 = vld [vmem:[#allocation11] sm:$0xff] }
  0x50   :  { %1096 = vmatprep.mubr.msk.f32.mxu0 %vm137_vm2, %v126_v16  ;;  %1146 = vmatpush3.msra.mxu0 %v573_v23  ;;  %v1474_v45 = vld [vmem:[%s1564_s4] ss:$0 sm:$0xff] }
  0x51   :  { %1124 = vmatmul.mubr.msk.f32.gmra.mxu1 %vm335_vm3, %v106_v17  ;;  %1147 = vmatprep.subr.mxu0 %v572_v40 }
  0x52   :  { %1126 = vmatprep.mubr.msk.f32.mxu1 %vm335_vm3, %v107_v21  ;;  %1148 = vmatpush3.msra.mxu0 %v572_v40 }
  0x53   :  { %1097 = vmatmul.mubr.msk.f32.gmra.mxu0 %vm137_vm2, %v127_v20 }
  0x54   :  { %1099 = vmatprep.mubr.msk.f32.mxu0 %vm137_vm2, %v128_v22 }
  0x55   :  { %1127 = vmatmul.mubr.msk.f32.gmra.mxu1 %vm335_vm3, %v108_v24 }
  0x56   :  { %1129 = vmatprep.mubr.msk.f32.mxu1 %vm335_vm3, %v109_v26 }
  0x57   :  { %1100 = vmatmul.mubr.msk.f32.gmra.mxu0 %vm137_vm2, %v129_v25 }
  0x58   :  { %1102 = vmatprep.mubr.msk.f32.mxu0 %vm137_vm2, %v130_v27 }
  0x59   :  { %1130 = vmatmul.mubr.msk.f32.gmra.mxu1 %vm335_vm3, %v110_v28 }
  0x5a   :  { %1132 = vmatprep.mubr.msk.f32.mxu1 %vm335_vm3, %v111_v30 }
  0x5b   :  { %1103 = vmatmul.mubr.msk.f32.gmra.mxu0 %vm137_vm2, %v131_v29 }
  0x5c   :  { %1105 = vmatprep.mubr.msk.f32.mxu0 %vm137_vm2, %v132_v31 }
  0x5d   :  { %1133 = vmatmul.mubr.msk.f32.gmra.mxu1 %vm335_vm3, %v112_v32 }
  0x5e   :  { %1135 = vmatprep.mubr.msk.f32.mxu1 %vm335_vm3, %v113_v34 }
  0x5f   :  { %1106 = vmatmul.mubr.msk.f32.gmra.mxu0 %vm137_vm2, %v133_v33 }
  0x60   :  { %1108 = vmatprep.mubr.msk.f32.mxu0 %vm137_vm2, %v134_v35 }
  0x61   :  { %1136 = vmatmul.mubr.msk.f32.gmra.mxu1 %vm335_vm3, %v114_v36 }
  0x62   :  { %1138 = vmatprep.mubr.msk.f32.mxu1 %vm335_vm3, %v115_v38 }
  0x63   :  { %1109 = vmatmul.mubr.msk.f32.gmra.mxu0 %vm137_vm2, %v135_v37 }
  0x65   :  { %1139 = vmatmul.mubr.msk.f32.gmra.mxu1 %vm335_vm3, %v116_v39 }
 0x107   :  { %v1089_v41 = vpop.f32.mrf.mxu0 }
 0x109   :  { %v256_v42 = vpop.f32.mrf.mxu0  ;;  %v1119_v43 = vpop.f32.mrf.mxu1 }
 0x10a   :  { %v460_v44 = vadd.f32 %v1119_v43, %v1089_v41 }
 0x10b   :  { %v1092_v46 = vpop.f32.mrf.mxu0  ;;  %v454_v47 = vpop.f32.mrf.mxu1 }
 0x10c   :  { %v455_v48 = vadd.f32 %v454_v47, %v256_v42  ;;  %v541_v50 = vadd.f32 %v1474_v45, %v460_v44 }
 0x10d   :  { %v266_v49 = vpop.f32.mrf.mxu0  ;;  %v1122_v51 = vpop.f32.mrf.mxu1 }
 0x10e   :  { %v540_v52 = vadd.f32 %v1474_v45, %v455_v48  ;;  %v470_v53 = vadd.f32 %v1122_v51, %v1092_v46  ;;  %v557_v59 = vmax.f32 %v541_v50, 0.0 }
 0x10f   :  { %v1095_v54 = vpop.f32.mrf.mxu0  ;;  %v464_v55 = vpop.f32.mrf.mxu1 }
 0x110   :  { %v556_v56 = vmax.f32 %v540_v52, 0.0  ;;  %v465_v57 = vadd.f32 %v464_v55, %v266_v49  ;;  %v543_v60 = vadd.f32 %v1474_v45, %v470_v53 }
 0x111   :  { %v276_v58 = vpop.f32.mrf.mxu0  ;;  %v1125_v61 = vpop.f32.mrf.mxu1 }
 0x112   :  { %v542_v62 = vadd.f32 %v1474_v45, %v465_v57  ;;  %v480_v63 = vadd.f32 %v1125_v61, %v1095_v54  ;;  %1149 = vmatprep.mubr.msk.f32.mxu0 %vm583_vm4, %v556_v56  ;;  %v559_v5 = vmax.f32 %v543_v60, 0.0  ;;  %v794_v60 = vld [vmem:[#allocation2] sm:$0x1]  ;;  %v1357_v61 = vmov 0  }
 0x113   :  { %v1098_v0 = vpop.f32.mrf.mxu0  ;;  %v474_v1 = vpop.f32.mrf.mxu1  ;;  %1150 = vmatmul.mubr.msk.f32.vlgmr.msra.gmra.mxu0 %vm583_vm4, %v557_v59  ;;  %v1355_v59 = vmov 0.0   ;;  %1219 = vset.pattern.permute.xlu0 %v1357_v61 }
 0x114   :  { %v558_v2 = vmax.f32 %v542_v62, 0.0  ;;  %v475_v3 = vadd.f32 %v474_v1, %v276_v58  ;;  %v545_v6 = vadd.f32 %v1474_v45, %v480_v63  ;;  %1173 = vmatprep.subr.mxu1 %v1355_v59  ;;  %1205 = vmatprep.mubr.msk.f32.mxu1 %vm1356_vm5, %v1355_v59 }
 0x115   :  { %v286_v4 = vpop.f32.mrf.mxu0  ;;  %v1128_v7 = vpop.f32.mrf.mxu1  ;;  %797 = vperm.xlu0 %1219, %v794_v60  }
 0x116   :  { %v544_v8 = vadd.f32 %v1474_v45, %v475_v3  ;;  %v490_v9 = vadd.f32 %v1128_v7, %v1098_v0  ;;  %1152 = vmatprep.mubr.msk.f32.mxu0 %vm583_vm4, %v558_v2  ;;  %v561_v15 = vmax.f32 %v545_v6, 0.0 }
 0x117   :  { %v1101_v10 = vpop.f32.mrf.mxu0  ;;  %v484_v11 = vpop.f32.mrf.mxu1  ;;  %1153 = vmatmul.mubr.msk.f32.gmra.mxu0 %vm583_vm4, %v559_v5 }
 0x118   :  { %v560_v12 = vmax.f32 %v544_v8, 0.0  ;;  %v485_v13 = vadd.f32 %v484_v11, %v286_v4  ;;  %v547_v16 = vadd.f32 %v1474_v45, %v490_v9  ;;  %v978_v11 = vld [vmem:[%s1566_s6] ss:$0 sm:$0xff] }
 0x119   :  { %v296_v14 = vpop.f32.mrf.mxu0  ;;  %v1131_v17 = vpop.f32.mrf.mxu1 }
 0x11a   :  { %v546_v18 = vadd.f32 %v1474_v45, %v485_v13  ;;  %v500_v19 = vadd.f32 %v1131_v17, %v1101_v10  ;;  %1155 = vmatprep.mubr.msk.f32.mxu0 %vm583_vm4, %v560_v12  ;;  %v563_v25 = vmax.f32 %v547_v16, 0.0 }
 0x11b   :  { %v1104_v20 = vpop.f32.mrf.mxu0  ;;  %v494_v21 = vpop.f32.mrf.mxu1  ;;  %1156 = vmatmul.mubr.msk.f32.gmra.mxu0 %vm583_vm4, %v561_v15 }
 0x11c   :  { %v562_v22 = vmax.f32 %v546_v18, 0.0  ;;  %v495_v23 = vadd.f32 %v494_v21, %v296_v14  ;;  %v549_v26 = vadd.f32 %v1474_v45, %v500_v19 }
 0x11d   :  { %v306_v24 = vpop.f32.mrf.mxu0  ;;  %v1134_v27 = vpop.f32.mrf.mxu1 }
 0x11e   :  { %v548_v28 = vadd.f32 %v1474_v45, %v495_v23  ;;  %v510_v29 = vadd.f32 %v1134_v27, %v1104_v20  ;;  %1158 = vmatprep.mubr.msk.f32.mxu0 %vm583_vm4, %v562_v22  ;;  %v565_v35 = vmax.f32 %v549_v26, 0.0 }
 0x11f   :  { %v1107_v30 = vpop.f32.mrf.mxu0  ;;  %v504_v31 = vpop.f32.mrf.mxu1  ;;  %1159 = vmatmul.mubr.msk.f32.gmra.mxu0 %vm583_vm4, %v563_v25 }
 0x120   :  { %v564_v32 = vmax.f32 %v548_v28, 0.0  ;;  %v505_v33 = vadd.f32 %v504_v31, %v306_v24  ;;  %v551_v36 = vadd.f32 %v1474_v45, %v510_v29 }
 0x121   :  { %v316_v34 = vpop.f32.mrf.mxu0  ;;  %v1137_v37 = vpop.f32.mrf.mxu1 }
 0x122   :  { %v550_v38 = vadd.f32 %v1474_v45, %v505_v33  ;;  %v520_v39 = vadd.f32 %v1137_v37, %v1107_v30  ;;  %1161 = vmatprep.mubr.msk.f32.mxu0 %vm583_vm4, %v564_v32  ;;  %v567_v44 = vmax.f32 %v551_v36, 0.0 }
 0x123   :  { %v1110_v40 = vpop.f32.mrf.mxu0  ;;  %v514_v41 = vpop.f32.mrf.mxu1  ;;  %1162 = vmatmul.mubr.msk.f32.gmra.mxu0 %vm583_vm4, %v565_v35 }
 0x124   :  { %v566_v42 = vmax.f32 %v550_v38, 0.0  ;;  %v515_v43 = vadd.f32 %v514_v41, %v316_v34  ;;  %v553_v46 = vadd.f32 %v1474_v45, %v520_v39 }
 0x125   :  { %v1140_v47 = vpop.f32.mrf.mxu1  ;;  %v326_v50 = vpop.f32.mrf.mxu0 }
 0x126   :  { %v552_v48 = vadd.f32 %v1474_v45, %v515_v43  ;;  %v530_v49 = vadd.f32 %v1140_v47, %v1110_v40  ;;  %1164 = vmatprep.mubr.msk.f32.mxu0 %vm583_vm4, %v566_v42  ;;  %v569_v54 = vmax.f32 %v553_v46, 0.0  ;;  %v793_v47 = vld [vmem:[%s1567_s7] sm:$0x1] }
 0x127   :  { %v524_v51 = vpop.f32.mrf.mxu1  ;;  %1165 = vmatmul.mubr.msk.f32.gmra.mxu0 %vm583_vm4, %v567_v44 }
 0x128   :  { %v568_v52 = vmax.f32 %v552_v48, 0.0  ;;  %v525_v53 = vadd.f32 %v524_v51, %v326_v50  ;;  %v555_v55 = vadd.f32 %v1474_v45, %v530_v49  ;;  %v800_v48 = vlaneseq }
 0x12a   :  { %v554_v56 = vadd.f32 %v1474_v45, %v525_v53  ;;  %1167 = vmatprep.mubr.msk.f32.mxu0 %vm583_vm4, %v568_v52  ;;  %v571_v58 = vmax.f32 %v555_v55, 0.0  ;;  %v801_v49 = vshrl.u32 %v800_v48, 7 }
 0x12b   :  { %1168 = vmatmul.mubr.msk.f32.gmra.mxu0 %vm583_vm4, %v569_v54 }
 0x12c   :  { %v570_v57 = vmax.f32 %v554_v56, 0.0  ;;  %v802_v50 = vsub.s32 0, %v801_v49 }
 0x12e   :  { %1170 = vmatprep.mubr.msk.f32.mxu0 %vm583_vm4, %v570_v57 }
 0x12f   :  { %1171 = vmatmul.mubr.msk.f32.gmra.mxu0 %vm583_vm4, %v571_v58 }
 0x190   :  { %v798_v51 = vpop.permute.xlu0 %797 }
 0x191   :  { %v803_v52 = vrot.slane %v798_v51, %v802_v50 }
 0x1d3   :  { %v1510_v45 = vpop.f32.mrf.mxu0 }
 0x1d4   :  { %v704_v41 = vadd.f32 %v1510_v45, %v978_v11 }
 0x1d5   :  { %v1512_v62 = vpop.f32.mrf.mxu0 }
 0x1d6   :  { %v778_v43 = vmax.f32 %v704_v41, 0.0  ;;  %v699_v44 = vadd.f32 %v978_v11, %v1512_v62 }
 0x1d7   :  { %v1154_v63 = vpop.f32.mrf.mxu0 }
 0x1d8   :  { %v714_v37 = vadd.f32 %v1154_v63, %v978_v11  ;;  %v777_v46 = vmax.f32 %v699_v44, 0.0 }
 0x1d9   :  { %v1514_v0 = vpop.f32.mrf.mxu0 }
 0x1da   :  { %v780_v39 = vmax.f32 %v714_v37, 0.0  ;;  %v709_v40 = vadd.f32 %v978_v11, %v1514_v0 }
 0x1db   :  { %v1157_v1 = vpop.f32.mrf.mxu0 }
 0x1dc   :  { %v724_v33 = vadd.f32 %v1157_v1, %v978_v11  ;;  %v779_v42 = vmax.f32 %v709_v40, 0.0 }
 0x1dd   :  { %v718_v2 = vpop.f32.mrf.mxu0 }
 0x1de   :  { %v782_v35 = vmax.f32 %v724_v33, 0.0  ;;  %v719_v36 = vadd.f32 %v978_v11, %v718_v2 }
 0x1df   :  { %v1160_v3 = vpop.f32.mrf.mxu0 }
 0x1e0   :  { %v734_v29 = vadd.f32 %v1160_v3, %v978_v11  ;;  %v781_v38 = vmax.f32 %v719_v36, 0.0 }
 0x1e1   :  { %v728_v4 = vpop.f32.mrf.mxu0 }
 0x1e2   :  { %v784_v31 = vmax.f32 %v734_v29, 0.0  ;;  %v729_v32 = vadd.f32 %v978_v11, %v728_v4 }
 0x1e3   :  { %v1163_v5 = vpop.f32.mrf.mxu0 }
 0x1e4   :  { %v744_v25 = vadd.f32 %v1163_v5, %v978_v11  ;;  %v783_v34 = vmax.f32 %v729_v32, 0.0 }
 0x1e5   :  { %v738_v6 = vpop.f32.mrf.mxu0 }
 0x1e6   :  { %v786_v27 = vmax.f32 %v744_v25, 0.0  ;;  %v739_v28 = vadd.f32 %v978_v11, %v738_v6 }
 0x1e7   :  { %v1166_v7 = vpop.f32.mrf.mxu0 }
 0x1e8   :  { %v754_v21 = vadd.f32 %v1166_v7, %v978_v11  ;;  %v785_v30 = vmax.f32 %v739_v28, 0.0 }
 0x1e9   :  { %v748_v8 = vpop.f32.mrf.mxu0 }
 0x1ea   :  { %v788_v23 = vmax.f32 %v754_v21, 0.0  ;;  %v749_v24 = vadd.f32 %v978_v11, %v748_v8 }
 0x1eb   :  { %v1169_v9 = vpop.f32.mrf.mxu0 }
 0x1ec   :  { %v764_v17 = vadd.f32 %v1169_v9, %v978_v11  ;;  %v787_v26 = vmax.f32 %v749_v24, 0.0 }
 0x1ed   :  { %v758_v10 = vpop.f32.mrf.mxu0 }
 0x1ee   :  { %v790_v19 = vmax.f32 %v764_v17, 0.0  ;;  %v759_v20 = vadd.f32 %v978_v11, %v758_v10 }
 0x1ef   :  { %v1172_v12 = vpop.f32.mrf.mxu0 }
 0x1f0   :  { %v774_v13 = vadd.f32 %v1172_v12, %v978_v11  ;;  %v789_v22 = vmax.f32 %v759_v20, 0.0 }
 0x1f1   :  { %v768_v14 = vpop.f32.mrf.mxu0 }
 0x1f2   :  { %v792_v15 = vmax.f32 %v774_v13, 0.0  ;;  %v769_v16 = vadd.f32 %v978_v11, %v768_v14 }
 0x1f4   :  { %1174 = vmatpush3.xpose.msk.msra.mxu1 %vm583_vm4, %v792_v15  ;;  %v791_v18 = vmax.f32 %v769_v16, 0.0 }
 0x1f5   :  { %1175 = vmatprep.subr.mxu1 %v1355_v59 }
 0x1f8   :  { %1176 = vmatpush3.xpose.msk.msra.mxu1 %vm583_vm4, %v791_v18 }
 0x1f9   :  { %1177 = vmatprep.subr.mxu1 %v1355_v59 }
 0x1fc   :  { %1178 = vmatpush3.xpose.msk.msra.mxu1 %vm583_vm4, %v790_v19 }
 0x1fd   :  { %1179 = vmatprep.subr.mxu1 %v1355_v59 }
 0x200   :  { %1180 = vmatpush3.xpose.msk.msra.mxu1 %vm583_vm4, %v789_v22 }
 0x201   :  { %1181 = vmatprep.subr.mxu1 %v1355_v59 }
 0x204   :  { %1182 = vmatpush3.xpose.msk.msra.mxu1 %vm583_vm4, %v788_v23 }
 0x205   :  { %1183 = vmatprep.subr.mxu1 %v1355_v59 }
 0x208   :  { %1184 = vmatpush3.xpose.msk.msra.mxu1 %vm583_vm4, %v787_v26 }
 0x209   :  { %1185 = vmatprep.subr.mxu1 %v1355_v59 }
 0x20c   :  { %1186 = vmatpush3.xpose.msk.msra.mxu1 %vm583_vm4, %v786_v27 }
 0x20d   :  { %1187 = vmatprep.subr.mxu1 %v1355_v59 }
 0x210   :  { %1188 = vmatpush3.xpose.msk.msra.mxu1 %vm583_vm4, %v785_v30 }
 0x211   :  { %1189 = vmatprep.subr.mxu1 %v1355_v59 }
 0x214   :  { %1190 = vmatpush3.xpose.msk.msra.mxu1 %vm583_vm4, %v784_v31 }
 0x215   :  { %1191 = vmatprep.subr.mxu1 %v1355_v59 }
 0x218   :  { %1192 = vmatpush3.xpose.msk.msra.mxu1 %vm583_vm4, %v783_v34 }
 0x219   :  { %1193 = vmatprep.subr.mxu1 %v1355_v59 }
 0x21c   :  { %1194 = vmatpush3.xpose.msk.msra.mxu1 %vm583_vm4, %v782_v35 }
 0x21d   :  { %1195 = vmatprep.subr.mxu1 %v1355_v59 }
 0x220   :  { %1196 = vmatpush3.xpose.msk.msra.mxu1 %vm583_vm4, %v781_v38 }
 0x221   :  { %1197 = vmatprep.subr.mxu1 %v1355_v59 }
 0x224   :  { %1198 = vmatpush3.xpose.msk.msra.mxu1 %vm583_vm4, %v780_v39 }
 0x225   :  { %1199 = vmatprep.subr.mxu1 %v1355_v59 }
 0x228   :  { %1200 = vmatpush3.xpose.msk.msra.mxu1 %vm583_vm4, %v779_v42 }
 0x229   :  { %1201 = vmatprep.subr.mxu1 %v1355_v59 }
 0x22c   :  { %1202 = vmatpush3.xpose.msk.msra.mxu1 %vm583_vm4, %v778_v43 }
 0x22d   :  { %1203 = vmatprep.subr.mxu1 %v1355_v59 }
 0x230   :  { %1204 = vmatpush3.xpose.msk.msra.mxu1 %vm583_vm4, %v777_v46 }
 0x233   :  { %1206 = vmatmul.mubr.msk.f32.vlgmr.msra.gmra.mxu1 %vm583_vm4, %v793_v47 }
 0x2f3   :  { %v921_v53 = vpop.f32.mrf.mxu1 }
 0x2f4   :  { %v922_v54 = vadd.f32 %v921_v53, %v803_v52 }
 0x2f5   :  { %v1207_v55 = vpop.f32.mrf.mxu1 }
 0x2f6   :  { %925 = vst [vmem:[#allocation12] sm:$0x1] %v922_v54 }
 0x2f7   :  { %1331 = shalt.err (!%p1328_p1)
}
 0x2f8   :  { %935 = dma.vmem_to_hbm [thread:$0]  %s933_s17, 16, %s1569_s9, [#allocation5]  }
 0x2f9   :  { %1346 = dma.done.wait [#allocation5], 16  }
 0x2fa   :  { %1347 = vsyncadd [#allocation5], 4294967280 }
 0x2fb   :  { %939 = vsyncpa [#allocation4], 1 }
 0x2fc   :  { %940 = vsyncpa [#allocation7], 1 }
 0x2fd   :  { %941 = vsyncpa [#allocation10], 1 }
 0x2fe   :  { %942 = vsyncpa [#allocation5], 1 }

</bundles_post_ra>
